<compile_context>
chip_gen: v6e
topology: v6e:2x2x1
jax: 0.10.0
libtpu: 0.0.40
codegen_flags: <defaults>
</compile_context>

<pallas_src>
import functools

import jax
import jax.numpy as jnp
from jax.experimental import pallas as pl
from jax.experimental.pallas import tpu as pltpu

LANES = 128
SUBLANES = 8


def _round_up(x, m):
    return (x + m - 1) // m * m


def _chip_generation():
    """Best-effort TPU generation (5, 6, 7, ...); 0 if unknown."""
    try:
        kind = jax.devices()[0].device_kind.lower()
    except Exception:
        return 0
    for g in (7, 6, 5, 4, 3, 2):
        if str(g) in kind:
            return g
    return 0


def _silog_partial_kernel(pred_ref, tgt_ref, out_ref, *, rows, tile_rows,
                          steps, needs_mask):
    c = pl.program_id(0)
    i = pl.program_id(1)

    @pl.when(i == 0)
    def _():
        out_ref[...] = jnp.zeros_like(out_ref)

    p = pred_ref[...].astype(jnp.float32)
    t = tgt_ref[...].astype(jnp.float32)
    # Two EUP logs: matches the reference formula and avoids the f32 divide's
    # Newton-Raphson refinement on the VPU (EUP slot is otherwise idle-ish).
    d = jnp.log(t) - jnp.log(p)

    if needs_mask:
        # Ragged tail: boundary blocks may overrun the real `rows` rows and
        # read garbage.  Select AFTER computing d so NaN/Inf from garbage is
        # discarded (a 0/1 multiply would propagate NaN).
        start_row = (c * steps + i) * tile_rows
        local_row = jax.lax.broadcasted_iota(jnp.int32, d.shape, 0)
        d = jnp.where(start_row + local_row < rows, d, 0.0)

    d3 = d.reshape(tile_rows // SUBLANES, SUBLANES, LANES)
    # Per-lane partial sums: pure VPU adds in the hot loop.  The single heavy
    # cross-lane/sublane reduction happens once in the JAX epilogue.
    out_ref[0, 0:SUBLANES, :] += jnp.sum(d3, axis=0)
    out_ref[0, SUBLANES:2 * SUBLANES, :] += jnp.sum(d3 * d3, axis=0)


def silog_loss(pred, target, lambd=0.5):
    """Scale-invariant log loss; pred/target any shape (e.g. NCHW), positive."""
    assert pred.shape == target.shape
    n_elems = pred.size

    gen = _chip_generation()
    num_cores = 2 if gen >= 7 else 1            # only v7x has 2 TensorCores/chip
    max_tile_rows = 8192 if gen >= 6 else 4096  # 4 MiB vs 2 MiB input blocks

    pred_flat = pred.reshape(-1)
    tgt_flat = target.reshape(-1)

    # Pad only to a multiple of 128 lanes (<= 127 elements, rare path); both
    # tensors get the same value so diff_log == 0 in the pad region.
    lane_pad = (-n_elems) % LANES
    if lane_pad:
        pred_flat = jnp.pad(pred_flat, (0, lane_pad), constant_values=1.0)
        tgt_flat = jnp.pad(tgt_flat, (0, lane_pad), constant_values=1.0)

    rows = (n_elems + lane_pad) // LANES
    tile_rows = min(max_tile_rows, _round_up(rows, SUBLANES))
    if rows <= tile_rows:
        num_cores = 1  # tiny input: nothing to split across cores
    steps = pl.cdiv(rows, num_cores * tile_rows)
    needs_mask = num_cores * steps * tile_rows != rows

    pred2d = pred_flat.reshape(rows, LANES)
    tgt2d = tgt_flat.reshape(rows, LANES)

    # Clamp block indices so a logically-out-of-range block (possible for the
    # second core on very uneven splits) stays in bounds; the in-kernel row
    # mask (computed from program ids, not data) still zeroes its contribution.
    last_block = pl.cdiv(rows, tile_rows) - 1
    in_map = lambda c, i: (jnp.minimum(c * steps + i, last_block), 0)

    kernel = functools.partial(
        _silog_partial_kernel,
        rows=rows, tile_rows=tile_rows, steps=steps, needs_mask=needs_mask,
    )

    if num_cores > 1:
        dim_sem = (pltpu.CORE_PARALLEL, pltpu.ARBITRARY)
    else:
        dim_sem = ("arbitrary", "arbitrary")

    in_bytes = n_elems * (pred.dtype.itemsize + target.dtype.itemsize)
    cost = pl.CostEstimate(
        flops=5 * n_elems,
        transcendentals=2 * n_elems,
        bytes_accessed=in_bytes + num_cores * 2 * SUBLANES * LANES * 4,
    )

    partials = pl.pallas_call(
        kernel,
        out_shape=jax.ShapeDtypeStruct(
            (num_cores, 2 * SUBLANES, LANES), jnp.float32),
        grid_spec=pltpu.PrefetchScalarGridSpec(
            num_scalar_prefetch=0,
            grid=(num_cores, steps),
            in_specs=[
                pl.BlockSpec((tile_rows, LANES), in_map),
                pl.BlockSpec((tile_rows, LANES), in_map),
            ],
            out_specs=pl.BlockSpec(
                (1, 2 * SUBLANES, LANES), lambda c, i: (c, 0, 0)),
        ),
        compiler_params=pltpu.CompilerParams(dimension_semantics=dim_sem),
        cost_estimate=cost,
    )(pred2d, tgt2d)

    # Tiny epilogue in plain JAX: combine per-core / per-lane partials.
    inv_n = 1.0 / float(n_elems)
    sum_d = jnp.sum(partials[:, 0:SUBLANES, :])
    sum_d2 = jnp.sum(partials[:, SUBLANES:2 * SUBLANES, :])
    mean_d = sum_d * inv_n
    mean_d2 = sum_d2 * inv_n
    # Clamp: reference would return NaN on a slightly negative rounding residual.
    var = jnp.maximum(mean_d2 - float(lambd) * mean_d * mean_d, 0.0)
    return jnp.sqrt(var)


def silog_loss_ref(pred, target, lambd=0.5):
    d = jnp.log(target) - jnp.log(pred)
    return jnp.sqrt(jnp.mean(d * d) - lambd * jnp.mean(d) ** 2)


if __name__ == "__main__":
    key = jax.random.PRNGKey(0)
    k1, k2, k3, k4 = jax.random.split(key, 4)

    # NCHW, strictly positive (log requires > 0), like depth predictions.
    shape = (2, 4, 16, 16)
    pred = jax.random.uniform(k1, shape, jnp.float32, minval=0.1, maxval=10.0)
    target = jax.random.uniform(k2, shape, jnp.float32, minval=0.1, maxval=10.0)

    loss = silog_loss(pred, target, lambd=0.5)
    jax.block_until_ready(loss)
    ref = silog_loss_ref(pred, target, lambd=0.5)
    assert jnp.allclose(loss, ref, rtol=1e-5, atol=1e-5), (loss, ref)

    # Ragged case (n_elems not a multiple of 128) exercises the in-kernel mask.
    rshape = (3, 5, 7, 11)
    pred_r = jax.random.uniform(k3, rshape, jnp.float32, minval=0.1, maxval=10.0)
    target_r = jax.random.uniform(k4, rshape, jnp.float32, minval=0.1, maxval=10.0)
    loss_r = silog_loss(pred_r, target_r, lambd=0.5)
    jax.block_until_ready(loss_r)
    ref_r = silog_loss_ref(pred_r, target_r, lambd=0.5)
    assert jnp.allclose(loss_r, ref_r, rtol=1e-5, atol=1e-5), (loss_r, ref_r)

    print("KERNEL_OK")
</pallas_src>

<mosaic_0001>
module attributes {stable_mosaic.version = 11 : i64} {
  func.func @_silog_partial_kernel(%arg0: i32, %arg1: i32, %arg2: memref<16x128xf32, #tpu.memory_space<vmem>>, %arg3: memref<16x128xf32, #tpu.memory_space<vmem>>, %arg4: memref<1x16x128xf32, #tpu.memory_space<vmem>>) attributes {dimension_semantics = [#tpu.dimension_semantics<arbitrary>, #tpu.dimension_semantics<arbitrary>], iteration_bounds = array<i64: 1, 1>, scalar_prefetch = 0 : i64, scratch_operands = 0 : i64, tpu.core_type = #tpu.core_type<tc>, window_params = [{transform_indices = @transform_0, window_bounds = array<i64: 16, 128>}, {transform_indices = @transform_1, window_bounds = array<i64: 16, 128>}, {transform_indices = @transform_2, window_bounds = array<i64: 1, 16, 128>}]} {
    %c0_i32 = arith.constant 0 : i32
    %0 = arith.cmpi eq, %arg1, %c0_i32 : i32
    %1 = arith.extui %0 : i1 to i32
    %c0_i32_0 = arith.constant 0 : i32
    %2 = arith.cmpi ne, %1, %c0_i32_0 : i32
    scf.if %2 {
      %cst_16 = arith.constant 0.000000e+00 : f32
      %24 = vector.broadcast %cst_16 : f32 to vector<1x16x128xf32>
      %c0_17 = arith.constant 0 : index
      %c0_18 = arith.constant 0 : index
      %c0_19 = arith.constant 0 : index
      %25 = vector.load %arg4[%c0_17, %c0_18, %c0_19] : memref<1x16x128xf32, #tpu.memory_space<vmem>>, vector<1x16x128xf32>
      tpu.vector_store %arg4[%c0_17, %c0_18, %c0_19], %24 {strides = array<i32>} : memref<1x16x128xf32, #tpu.memory_space<vmem>>, vector<1x16x128xf32>,
    } else {
    }
    %c0 = arith.constant 0 : index
    %c0_1 = arith.constant 0 : index
    %3 = vector.load %arg2[%c0, %c0_1] : memref<16x128xf32, #tpu.memory_space<vmem>>, vector<16x128xf32>
    %c0_2 = arith.constant 0 : index
    %c0_3 = arith.constant 0 : index
    %4 = vector.load %arg3[%c0_2, %c0_3] : memref<16x128xf32, #tpu.memory_space<vmem>>, vector<16x128xf32>
    %5 = math.log %4 : vector<16x128xf32>
    %6 = math.log %3 : vector<16x128xf32>
    %7 = arith.subf %5, %6 : vector<16x128xf32>
    %8 = vector.shape_cast %7 : vector<16x128xf32> to vector<2x8x128xf32>
    %c0_4 = arith.constant 0 : index
    %c0_5 = arith.constant 0 : index
    %c0_6 = arith.constant 0 : index
    %9 = vector.load %arg4[%c0_4, %c0_5, %c0_6] : memref<1x16x128xf32, #tpu.memory_space<vmem>>, vector<1x8x128xf32>
    %10 = vector.shape_cast %9 : vector<1x8x128xf32> to vector<8x128xf32>
    %cst = arith.constant dense<0.000000e+00> : vector<8x128xf32>
    %11 = vector.multi_reduction <add>, %8, %cst [0] : vector<2x8x128xf32> to vector<8x128xf32>
    %12 = arith.addf %10, %11 : vector<8x128xf32>
    %c0_7 = arith.constant 0 : index
    %c0_8 = arith.constant 0 : index
    %c0_9 = arith.constant 0 : index
    %13 = vector.load %arg4[%c0_7, %c0_8, %c0_9] : memref<1x16x128xf32, #tpu.memory_space<vmem>>, vector<1x8x128xf32>
    %14 = vector.shape_cast %13 : vector<1x8x128xf32> to vector<8x128xf32>
    %15 = vector.shape_cast %12 : vector<8x128xf32> to vector<1x8x128xf32>
    tpu.vector_store %arg4[%c0_7, %c0_8, %c0_9], %15 {strides = array<i32>} : memref<1x16x128xf32, #tpu.memory_space<vmem>>, vector<1x8x128xf32>,
    %c0_10 = arith.constant 0 : index
    %c8 = arith.constant 8 : index
    %c0_11 = arith.constant 0 : index
    %16 = vector.load %arg4[%c0_10, %c8, %c0_11] : memref<1x16x128xf32, #tpu.memory_space<vmem>>, vector<1x8x128xf32>
    %17 = vector.shape_cast %16 : vector<1x8x128xf32> to vector<8x128xf32>
    %18 = arith.mulf %8, %8 : vector<2x8x128xf32>
    %cst_12 = arith.constant dense<0.000000e+00> : vector<8x128xf32>
    %19 = vector.multi_reduction <add>, %18, %cst_12 [0] : vector<2x8x128xf32> to vector<8x128xf32>
    %20 = arith.addf %17, %19 : vector<8x128xf32>
    %c0_13 = arith.constant 0 : index
    %c8_14 = arith.constant 8 : index
    %c0_15 = arith.constant 0 : index
    %21 = vector.load %arg4[%c0_13, %c8_14, %c0_15] : memref<1x16x128xf32, #tpu.memory_space<vmem>>, vector<1x8x128xf32>
    %22 = vector.shape_cast %21 : vector<1x8x128xf32> to vector<8x128xf32>
    %23 = vector.shape_cast %20 : vector<8x128xf32> to vector<1x8x128xf32>
    tpu.vector_store %arg4[%c0_13, %c8_14, %c0_15], %23 {strides = array<i32>} : memref<1x16x128xf32, #tpu.memory_space<vmem>>, vector<1x8x128xf32>,
    return
  }
  func.func @transform_0(%arg0: i32, %arg1: i32) -> (i32, i32) {
    %c1_i32 = arith.constant 1 : i32
    %0 = arith.muli %arg0, %c1_i32 : i32
    %1 = arith.addi %0, %arg1 : i32
    %c0_i32 = arith.constant 0 : i32
    %2 = arith.minsi %1, %c0_i32 : i32
    %c0_i32_0 = arith.constant 0 : i32
    %c0_i32_1 = arith.constant 0 : i32
    return %2, %c0_i32_0 : i32, i32
  }
  func.func @transform_1(%arg0: i32, %arg1: i32) -> (i32, i32) {
    %c1_i32 = arith.constant 1 : i32
    %0 = arith.muli %arg0, %c1_i32 : i32
    %1 = arith.addi %0, %arg1 : i32
    %c0_i32 = arith.constant 0 : i32
    %2 = arith.minsi %1, %c0_i32 : i32
    %c0_i32_0 = arith.constant 0 : i32
    %c0_i32_1 = arith.constant 0 : i32
    return %2, %c0_i32_0 : i32, i32
  }
  func.func @transform_2(%arg0: i32, %arg1: i32) -> (i32, i32, i32) {
    %c0_i32 = arith.constant 0 : i32
    %c0_i32_0 = arith.constant 0 : i32
    %c0_i32_1 = arith.constant 0 : i32
    return %arg0, %c0_i32, %c0_i32_0 : i32, i32, i32
  }
}

</mosaic_0001>

<bundles_post_ra>
// kernel: tpu_custom_call.1
= control target key start
LH: loop header
LB: loop body
LE: loop exit
PB: predicated region body
PF: predicated region fallthrough
CT: control target
= control target key end

     0   :  { %7 = vsyncpa [#allocation3], 0  ;;  %s230_s0 = inlined_call_operand.hbm [shape: f32[16,128], index: 0, kind: input, shape index: {}]   ;;  %s231_s1 = inlined_call_operand.hbm [shape: f32[16,128], index: 1, kind: input, shape index: {}]   ;;  %s232_s2 = inlined_call_operand.hbm [shape: f32[1,16,128], index: 2, kind: output, shape index: {}]  }
   0x1   :  { %8 = vsyncpa [#allocation6], 0 }
   0x2   :  { %9 = vsyncpa [#allocation4], 0  ;;  %s192_s9 = smov [#allocation2]  }
   0x3   :  { %s21_s10 = sshll.u32 %s192_s9, 4  ;;  %s22_s10 = int_to_ptr.vmem [resolvable:$true] %s21_s10 }
   0x4   :  { %s134_s11 = scalar_lea.vmem %s22_s10, 256  ;;  %p139_p1 = scmp.lt.s32.totalorder %s22_s10, %s22_s10 }
   0x5   :  { %p135_p0 = scmp.ne.s32.totalorder %s22_s10, %s134_s11  ;;  %p140_p2 = scmp.lt.s32.totalorder %s134_s11, %s134_s11 }
   0x7   :  { %p141_p3 = por %p140_p2, %p139_p1 }
   0x9   :  { %p142_p4 = pnand %p141_p3, %p135_p0 }
   0xb   :  { %145 = shalt.err (!%p142_p4)
}
   0xc   :  { %s193_s12 = smov 128   ;;  %s194_s13 = smov 8  }
   0xd   :  { %27 = dma.hbm_to_vmem [thread:$0]  %s230_s0, 256, %s22_s10, [#allocation3], %s193_s12, %s193_s12, %s194_s13  }
   0xe   :  { %s195_s16 = smov [#allocation5]  }
   0xf   :  { %s39_s17 = sshll.u32 %s195_s16, 4  ;;  %s40_s17 = int_to_ptr.vmem [resolvable:$true] %s39_s17 }
  0x10   :  { %s154_s18 = scalar_lea.vmem %s40_s17, 256  ;;  %p159_p6 = scmp.lt.s32.totalorder %s40_s17, %s40_s17 }
  0x11   :  { %p155_p5 = scmp.ne.s32.totalorder %s40_s17, %s154_s18  ;;  %p160_p7 = scmp.lt.s32.totalorder %s154_s18, %s154_s18 }
  0x13   :  { %p161_p8 = por %p160_p7, %p159_p6 }
  0x15   :  { %p162_p9 = pnand %p161_p8, %p155_p5 }
  0x17   :  { %165 = shalt.err (!%p162_p9)
}
  0x18   :  { %45 = dma.hbm_to_vmem [thread:$0]  %s231_s1, 256, %s40_s17, [#allocation6], %s193_s12, %s193_s12, %s194_s13  }
  0x19   :  { %186 = dma.done.wait [#allocation3], 256  }
  0x1a   :  { %187 = vsyncadd [#allocation3], 4294967040 }
  0x1b   :  { %188 = dma.done.wait [#allocation6], 256  }
  0x1c   :  { %189 = vsyncadd [#allocation6], 4294967040  ;;  %v66_v0 = vld [vmem:[#allocation2] sm:$0xff]  ;;  %v68_v1 = vld [vmem:[#allocation5] sm:$0xff]  ;;  %s196_s0 = smov [#allocation7]  }
  0x1d   :  { %v67_v2 = vld [vmem:[#allocation2 + $0x8] sm:$0xff]  ;;  %v69_v3 = vld [vmem:[#allocation5 + $0x8] sm:$0xff]  ;;  %118 = vlog2.f32 %v68_v1  ;;  %s95_s1 = sshll.u32 %s196_s0, 4  ;;  %s96_s1 = int_to_ptr.vmem [resolvable:$true] %s95_s1 }
  0x1e   :  { %120 = vlog2.f32 %v69_v3  ;;  %s166_s21 = scalar_lea.vmem %s96_s1, 256  ;;  %p171_p11 = scmp.lt.s32.totalorder %s96_s1, %s96_s1 }
  0x1f   :  { %122 = vlog2.f32 %v66_v0  ;;  %p167_p10 = scmp.ne.s32.totalorder %s96_s1, %s166_s21  ;;  %p172_p12 = scmp.lt.s32.totalorder %s166_s21, %s166_s21 }
  0x20   :  { %124 = vlog2.f32 %v67_v2 }
  0x21   :  { %p173_p13 = por %p172_p12, %p171_p11 }
  0x23   :  { %p174_p0 = pnand %p173_p13, %p167_p10 }
  0x2a   :  { %v119_v4 = vpop.eup %118 }
  0x2b   :  { %v121_v5 = vpop.eup %120  ;;  %v71_v6 = vmul.f32 0.6931472, %v119_v4 }
  0x2c   :  { %v123_v7 = vpop.eup %122  ;;  %v73_v8 = vmul.f32 0.6931472, %v121_v5 }
  0x2d   :  { %v125_v9 = vpop.eup %124  ;;  %v75_v10 = vmul.f32 0.6931472, %v123_v7 }
  0x2e   :  { %v77_v11 = vmul.f32 0.6931472, %v125_v9 }
  0x2f   :  { %v78_v12 = vsub.f32 %v71_v6, %v75_v10 }
  0x30   :  { %v79_v13 = vsub.f32 %v73_v8, %v77_v11 }
  0x31   :  { %v85_v14 = vmul.f32 %v78_v12, %v78_v12 }
  0x32   :  { %v81_v15 = vadd.f32 %v79_v13, %v78_v12  ;;  %v86_v16 = vmul.f32 %v79_v13, %v79_v13 }
  0x34   :  { %v87_v17 = vadd.f32 %v86_v16, %v85_v14  ;;  %83 = vst [vmem:[#allocation7] sm:$0xff] %v81_v15 }
  0x36   :  { %89 = vst [vmem:[#allocation7 + $0x8] sm:$0xff] %v87_v17 }
  0x37   :  { %177 = shalt.err (!%p174_p0)
}
  0x38   :  { %101 = dma.vmem_to_hbm [thread:$0]  %s96_s1, 256, %s232_s2, [#allocation4], %s193_s12, %s193_s12, %s194_s13  }
  0x39   :  { %190 = dma.done.wait [#allocation4], 256  }
  0x3a   :  { %191 = vsyncadd [#allocation4], 4294967040 }
  0x3b   :  { %105 = vsyncpa [#allocation3], 1 }
  0x3c   :  { %106 = vsyncpa [#allocation6], 1 }
  0x3d   :  { %107 = vsyncpa [#allocation4], 1 }

</bundles_post_ra>
